<compile_context>
chip_gen: v7x
topology: tpu7x:2x2x1
jax: 0.10.0
libtpu: 0.0.40
codegen_flags: <defaults>
</compile_context>

<pallas_src>
import functools

import jax
import jax.numpy as jnp
from jax.experimental import pallas as pl
from jax.experimental.pallas import tpu as pltpu


def _margin_loss_kernel(pos_ref, neg_ref, partial_ref, *, margin, n_rows,
                        row_tile, fold_cols, mask_rows):
    """Hinge on this row tile + VPU-only partial reduce to an (8, out_cols) f32 tile."""
    pos = pos_ref[...].astype(jnp.float32)   # in-kernel cast (bf16/fp16 friendly)
    neg = neg_ref[...].astype(jnp.float32)
    hinge = jnp.maximum(jnp.float32(margin) - pos + neg, jnp.float32(0.0))
    rows, cols = hinge.shape

    if mask_rows:
        # Ragged last block: zero out rows past the true n_rows so the mean
        # isn't polluted by garbage in the padded DMA window.
        i = pl.program_id(0)
        row_ids = jax.lax.broadcasted_iota(jnp.int32, (rows, cols), 0)
        hinge = jnp.where(i * row_tile + row_ids < n_rows, hinge, jnp.float32(0.0))

    # Collapse groups of 8 rows (whole sublane tiles) with plain vreg adds.
    partial = hinge.reshape(rows // 8, 8, cols).sum(axis=0)

    if fold_cols:
        # Fold lane groups of 128 with lane-aligned slices (still pure VPU adds);
        # keeps the per-block writeback a fixed, lane-dense (8, 128) f32 tile.
        acc = partial[:, 0:128]
        for g in range(1, cols // 128):
            acc = acc + partial[:, g * 128:(g + 1) * 128]
        partial = acc

    partial_ref[0, :, :] = partial


def _pick_row_tile(n_rows, n_cols, itemsize, budget_bytes):
    """Largest multiple-of-8 row tile whose honest per-step footprint fits the budget."""
    out_cols = 128 if n_cols % 128 == 0 else n_cols
    # Per-row footprint: 2 inputs x 2 pipeline buffers of the native-dtype tile
    # plus ~3 tile-sized f32 temporaries (cast + hinge intermediates).
    bytes_per_row = 2 * 2 * n_cols * itemsize + 3 * n_cols * 4
    # Fixed: 2 pipeline buffers of the (8, out_cols) f32 output block.
    fixed_bytes = 2 * 8 * out_cols * 4
    max_rows = max(8, (budget_bytes - fixed_bytes) // bytes_per_row)
    row_tile = max(8, (max_rows // 8) * 8)  # no divisor requirement -> no 8-row cliff
    # Keep >= 2 grid blocks so both v7x TensorCores get work (free on 1-TC chips).
    if n_rows >= 16:
        cap = ((pl.cdiv(n_rows, 2) + 7) // 8) * 8
    else:
        cap = ((n_rows + 7) // 8) * 8
    return max(8, min(row_tile, cap))
    # TODO(synk): add a column grid axis for extremely wide score matrices where a
    # single 8-row stripe already exceeds the VMEM budget.


def margin_loss(pos_score, neg_score, margin, *, row_tile=None,
                vmem_budget_bytes=40 * 1024 * 1024):
    """Pallas equivalent of MarginLoss.forward: mean(relu(margin - pos + neg))."""
    assert pos_score.shape == neg_score.shape
    assert pos_score.ndim == 2
    n_rows, n_cols = pos_score.shape

    if row_tile is None:
        row_tile = _pick_row_tile(n_rows, n_cols, pos_score.dtype.itemsize,
                                  vmem_budget_bytes)
    assert row_tile % 8 == 0, "row_tile must be a multiple of 8 (sublane tiling)"

    n_blocks = pl.cdiv(n_rows, row_tile)
    mask_rows = (n_rows % row_tile) != 0
    fold_cols = (n_cols % 128) == 0
    out_cols = 128 if fold_cols else n_cols

    kernel = functools.partial(
        _margin_loss_kernel, margin=float(margin), n_rows=n_rows,
        row_tile=row_tile, fold_cols=fold_cols, mask_rows=mask_rows)

    partials = pl.pallas_call(
        kernel,
        out_shape=jax.ShapeDtypeStruct((n_blocks, 8, out_cols), jnp.float32),
        grid_spec=pltpu.PrefetchScalarGridSpec(
            num_scalar_prefetch=0,
            grid=(n_blocks,),
            in_specs=[
                pl.BlockSpec((row_tile, n_cols), lambda i: (i, 0)),
                pl.BlockSpec((row_tile, n_cols), lambda i: (i, 0)),
            ],
            out_specs=pl.BlockSpec((1, 8, out_cols), lambda i: (i, 0, 0)),
        ),
        compiler_params=pltpu.CompilerParams(
            dimension_semantics=("parallel",),        # independent per-block partials
            vmem_limit_bytes=48 * 1024 * 1024,        # fits v7x 64 MiB; lifts v5e/v6e defaults
        ),
    )(pos_score, neg_score)

    # Tiny epilogue: one reduce over the (n_blocks, 8, out_cols) partials + mean divisor.
    return jnp.sum(partials) / jnp.float32(n_rows * n_cols)


def margin_loss_ref(pos_score, neg_score, margin):
    return jnp.mean(jax.nn.relu(margin - pos_score + neg_score))


if __name__ == "__main__":
    key = jax.random.PRNGKey(0)
    k_pos, k_neg = jax.random.split(key)
    margin = 1.0  # MarginLoss(margin=1.0)

    # 1) Small f32 case: picker caps at 2 blocks, lane-dense (8,128) partials.
    pos_score = jax.random.normal(k_pos, (64, 128), dtype=jnp.float32)
    neg_score = jax.random.normal(k_neg, (64, 128), dtype=jnp.float32)
    out = jax.block_until_ready(margin_loss(pos_score, neg_score, margin))
    ref = margin_loss_ref(pos_score, neg_score, margin)
    assert jnp.allclose(out, ref, rtol=1e-6, atol=1e-6), (out, ref)

    # 2) bf16 case with a ragged last block (200 % 104 != 0): exercises the
    #    in-kernel f32 cast, row masking, and column folding.
    pos_bf16 = jax.random.normal(k_pos, (200, 256), dtype=jnp.float32).astype(jnp.bfloat16)
    neg_bf16 = jax.random.normal(k_neg, (200, 256), dtype=jnp.float32).astype(jnp.bfloat16)
    out_bf16 = jax.block_until_ready(margin_loss(pos_bf16, neg_bf16, margin))
    ref_bf16 = margin_loss_ref(
        pos_bf16.astype(jnp.float32), neg_bf16.astype(jnp.float32), margin)
    assert jnp.allclose(out_bf16, ref_bf16, rtol=1e-5, atol=1e-5), (out_bf16, ref_bf16)

    # 3) n_cols not a multiple of 128: exercises the (8, n_cols) partial fallback.
    pos_narrow = jax.random.normal(k_pos, (64, 96), dtype=jnp.float32)
    neg_narrow = jax.random.normal(k_neg, (64, 96), dtype=jnp.float32)
    out_narrow = jax.block_until_ready(margin_loss(pos_narrow, neg_narrow, margin))
    ref_narrow = margin_loss_ref(pos_narrow, neg_narrow, margin)
    assert jnp.allclose(out_narrow, ref_narrow, rtol=1e-6, atol=1e-6), (out_narrow, ref_narrow)

    print("KERNEL_OK")
</pallas_src>

<mosaic_0001>
module attributes {stable_mosaic.version = 11 : i64} {
  func.func @_margin_loss_kernel(%arg0: i32, %arg1: memref<32x128xf32, #tpu.memory_space<vmem>>, %arg2: memref<32x128xf32, #tpu.memory_space<vmem>>, %arg3: memref<1x8x128xf32, #tpu.memory_space<vmem>>) attributes {dimension_semantics = [#tpu.dimension_semantics<parallel>], iteration_bounds = array<i64: 2>, scalar_prefetch = 0 : i64, scratch_operands = 0 : i64, tpu.core_type = #tpu.core_type<tc>, window_params = [{transform_indices = @transform_0, window_bounds = array<i64: 32, 128>}, {transform_indices = @transform_1, window_bounds = array<i64: 32, 128>}, {transform_indices = @transform_2, window_bounds = array<i64: 1, 8, 128>}]} {
    %c0 = arith.constant 0 : index
    %c0_0 = arith.constant 0 : index
    %0 = vector.load %arg1[%c0, %c0_0] : memref<32x128xf32, #tpu.memory_space<vmem>>, vector<32x128xf32>
    %c0_1 = arith.constant 0 : index
    %c0_2 = arith.constant 0 : index
    %1 = vector.load %arg2[%c0_1, %c0_2] : memref<32x128xf32, #tpu.memory_space<vmem>>, vector<32x128xf32>
    %cst = arith.constant 1.000000e+00 : f32
    %2 = vector.broadcast %cst : f32 to vector<32x128xf32>
    %3 = arith.subf %2, %0 : vector<32x128xf32>
    %4 = arith.addf %3, %1 : vector<32x128xf32>
    %cst_3 = arith.constant 0.000000e+00 : f32
    %5 = vector.broadcast %cst_3 : f32 to vector<32x128xf32>
    %6 = arith.maximumf %4, %5 : vector<32x128xf32>
    %7 = vector.shape_cast %6 : vector<32x128xf32> to vector<4x8x128xf32>
    %cst_4 = arith.constant dense<0.000000e+00> : vector<8x128xf32>
    %8 = vector.multi_reduction <add>, %7, %cst_4 [0] : vector<4x8x128xf32> to vector<8x128xf32>
    %c0_5 = arith.constant 0 : index
    %c0_6 = arith.constant 0 : index
    %c0_7 = arith.constant 0 : index
    %9 = vector.load %arg3[%c0_5, %c0_6, %c0_7] : memref<1x8x128xf32, #tpu.memory_space<vmem>>, vector<1x8x128xf32>
    %10 = vector.shape_cast %9 : vector<1x8x128xf32> to vector<8x128xf32>
    %11 = vector.shape_cast %8 : vector<8x128xf32> to vector<1x8x128xf32>
    tpu.vector_store %arg3[%c0_5, %c0_6, %c0_7], %11 {strides = array<i32>} : memref<1x8x128xf32, #tpu.memory_space<vmem>>, vector<1x8x128xf32>,
    return
  }
  func.func @transform_0(%arg0: i32) -> (i32, i32) {
    %c0_i32 = arith.constant 0 : i32
    %c0_i32_0 = arith.constant 0 : i32
    return %arg0, %c0_i32 : i32, i32
  }
  func.func @transform_1(%arg0: i32) -> (i32, i32) {
    %c0_i32 = arith.constant 0 : i32
    %c0_i32_0 = arith.constant 0 : i32
    return %arg0, %c0_i32 : i32, i32
  }
  func.func @transform_2(%arg0: i32) -> (i32, i32, i32) {
    %c0_i32 = arith.constant 0 : i32
    %c0_i32_0 = arith.constant 0 : i32
    %c0_i32_1 = arith.constant 0 : i32
    return %arg0, %c0_i32, %c0_i32_0 : i32, i32, i32
  }
}

</mosaic_0001>

<bundles_post_ra>
// kernel: tpu_custom_call.1
= control target key start
LH: loop header
LB: loop body
LE: loop exit
PB: predicated region body
PF: predicated region fallthrough
CT: control target
= control target key end

     0   :  { %7 = vsyncpa [#allocation3], 0  ;;  %s781_s0 = inlined_call_operand.hbm [shape: f32[64,128], index: 0, kind: input, shape index: {}]   ;;  %s782_s1 = inlined_call_operand.hbm [shape: f32[64,128], index: 1, kind: input, shape index: {}]   ;;  %s783_s2 = inlined_call_operand.hbm [shape: f32[2,8,128], index: 2, kind: output, shape index: {}]  }
   0x1   :  { %9 = vsyncpa [#allocation3 + $0x1], 0 }
   0x2   :  { %10 = vsyncpa [#allocation6], 0 }
   0x3   :  { %12 = vsyncpa [#allocation6 + $0x1], 0 }
   0x4   :  { %13 = vsyncpa [#allocation4], 0 }
   0x5   :  { %15 = vsyncpa [#allocation4 + $0x1], 0  ;;  %s559_s9 = smov 0   ;;  %s561_s10 = smov 0  }
   0x6   :  { %s563_s11 = smov 0   ;;  %s565_s12 = smov 0  }
   0x7 LB: > { %s580_s13 = sadd.s32 4294967295, %s537_s12   ;;  %s335_s14 = sadd.s32 4294967294, %s537_s12   ;;  %s537_s12 = sphi %s565_s12, %s799_s12   ;;  %s533_s11 = sphi %s563_s11, %s798_s11   ;;  %s529_s10 = sphi %s561_s10, %s797_s10   ;;  %s525_s9 = sphi %s559_s9, %s796_s9  }
   0x8   : > { %s584_s15 = sadd.s32 1, %s537_s12   ;;  %s28_s16 = sadd.s32 1, %s533_s11 }
   0x9   : > { %s25_s17 = ssub.s32 %s537_s12, %s584_s15  ;;  %p35_p0 = scmp.ne.s32.totalorder %s533_s11, %s529_s10 }
   0xa   : > { %p26_p1 = scmp.eq.s32.totalorder %s25_s17, 0  ;;  %p36_p2 = scmp.eq.s32.totalorder %s537_s12, 0 }
   0xb   : > { %p41_p3 = scmp.ne.s32.totalorder %s529_s10, %s525_s9  ;;  %p42_p4 = scmp.eq.s32.totalorder %s580_s13, 0 }
   0xc   : > { %s596_s18 = scalar_select %p26_p1, %s533_s11, %s28_s16  }
   0xd   : > { %p598_p5 = por %p36_p2, %p35_p0  ;;  %p602_p6 = por %p42_p4, %p41_p3 }
   0xe   : > { %p91_p7 = scmp.eq.s32.totalorder %s580_s13, 1  ;;  %p97_p8 = scmp.eq.s32.totalorder %s335_s14, 1 }
   0xf   : > { %s787_s20 = scalar_select %p602_p6, 1, 0 }
  0x10   : > { %p371_p10 = scmp.lt.s32.totalorder %s537_s12, 2  ;;  %p609_p11 = por %p91_p7, %p35_p0 }
  0x11   : > { %p613_p12 = por %p97_p8, %p41_p3  ;;  %s618_s23 = sand.u32 1, %s533_s11  }
  0x12   : > { %s788_s21 = scalar_select %p609_p11, 1, 0 }
  0x13   : > { %s789_s22 = scalar_select %p613_p12, 1, 0 }
  0x14   : > { %s352_s24 = sshll.u32 %s537_s12, 9  ;;  %s338_s25 = sshll.u32 %s618_s23, 5 }
  0x15   : > { %s627_s28 = scalar_lea.hbm %s781_s0, %s352_s24  ;;  %s121_s29 = scalar_lea.vmem [#allocation2], %s338_s25 }
  0x16   : > { %s128_s30 = sshll.u32 %s121_s29, 4  ;;  %p633_p13 = pnand %p371_p10, %p598_p5  ;;  %s637_s30 = int_to_ptr.vmem [resolvable:$true] %s128_s30 }
  0x17   : > { %s118_s4 = scalar_lea.sflag [#allocation3], %s618_s23  ;;  %s407_s5 = scalar_lea.hbm %s627_s28, 512 }
  0x18   : > { %p408_p0 = scmp.ne.s32.totalorder %s627_s28, %s407_s5  ;;  %p409_p1 = pneg %p633_p13 }
  0x19   : > { %s412_s8 = scalar_lea.hbm %s781_s0, 1024  ;;  %p413_p4 = scmp.lt.u32.totalorder %s627_s28, %s781_s0 }
  0x1a   : > { %p410_p2 = pnand %p409_p1, %p408_p0  ;;  %p414_p5 = scmp.lt.u32.totalorder %s412_s8, %s407_s5 }
  0x1b   : > { %p416_p8 = scmp.lt.u32.totalorder %s407_s5, %s627_s28 }
  0x1c   : > { %p411_p3 = pneg %p410_p2  ;;  %p415_p7 = por %p414_p5, %p413_p4 }
  0x1e   : > { %p417_p10 = por %p416_p8, %p415_p7 }
  0x20   : > { %p418_p9 = pnand %p417_p10, %p411_p3 }
  0x22   : > { %421 = shalt.err (!%p418_p9)
}
  0x23   : > { %s422_s17 = scalar_lea.vmem %s637_s30, 512  ;;  %s539_s19 = smov [#allocation2]  }
  0x24   : > { %p423_p0 = scmp.ne.s32.totalorder %s637_s30, %s422_s17  ;;  %s427_s26 = sshll.u32 %s539_s19, 4  ;;  %s428_s26 = int_to_ptr.vmem [resolvable:$false] %s427_s26 }
  0x25   : > { %s429_s27 = scalar_lea.vmem %s428_s26, 1024  ;;  %p430_p11 = scmp.lt.s32.totalorder %s637_s30, %s428_s26 }
  0x26   : > { %p425_p2 = pnand %p423_p0, %p409_p1  ;;  %p431_p4 = scmp.lt.s32.totalorder %s429_s27, %s422_s17 }
  0x28   : > { %p426_p12 = pneg %p425_p2  ;;  %p432_p5 = por %p431_p4, %p430_p11 }
  0x2a   : > { %p433_p7 = pnand %p432_p5, %p426_p12 }
  0x2c   : > { %436 = shalt.err (!%p433_p7)
}
  0x2d   : > { %s540_s29 = smov 128   ;;  %s541_s5 = smov 8  }
  0x2e   : > { %363 = dma.hbm_to_vmem [thread:$0]  (!%p633_p13), %s627_s28, 512, %s637_s30, %s118_s4, %s540_s29, %s540_s29, %s541_s5  }
  0x2f   : > { %p344_p9 = scmp.ge.s32.totalorder %s537_s12, 1  ;;  %p157_p11 = scmp.lt.s32.totalorder %s537_s12, 3 }
  0x30   : > { %s681_s14 = scalar_lea.hbm %s782_s1, %s352_s24  ;;  %s142_s16 = scalar_lea.vmem [#allocation5], %s338_s25 }
  0x31   : > { %p672_p12 = pnand %p344_p9, %p157_p11  ;;  %s149_s17 = sshll.u32 %s142_s16, 4  ;;  %s685_s17 = int_to_ptr.vmem [resolvable:$true] %s149_s17 }
  0x32   : > { %s139_s28 = scalar_lea.sflag [#allocation6], %s618_s23  ;;  %s437_s30 = scalar_lea.hbm %s681_s14, 512 }
  0x33   : > { %p438_p3 = scmp.ne.s32.totalorder %s681_s14, %s437_s30  ;;  %s442_s24 = scalar_lea.hbm %s782_s1, 1024 }
  0x34   : > { %p443_p0 = scmp.lt.u32.totalorder %s681_s14, %s782_s1  ;;  %p444_p2 = scmp.lt.u32.totalorder %s442_s24, %s437_s30 }
  0x35   : > { %p440_p8 = pnand %p438_p3, %p409_p1  ;;  %p446_p5 = scmp.lt.u32.totalorder %s437_s30, %s681_s14 }
  0x36   : > { %p445_p4 = por %p444_p2, %p443_p0 }
  0x37   : > { %p441_p10 = pneg %p440_p8 }
  0x38   : > { %p447_p7 = por %p446_p5, %p445_p4 }
  0x3a   : > { %p448_p9 = pnand %p447_p7, %p441_p10 }
  0x3c   : > { %451 = shalt.err (!%p448_p9)
}
  0x3d   : > { %s452_s25 = scalar_lea.vmem %s685_s17, 512  ;;  %s542_s7 = smov [#allocation5]  }
  0x3e   : > { %p453_p11 = scmp.ne.s32.totalorder %s685_s17, %s452_s25  ;;  %s457_s8 = sshll.u32 %s542_s7, 4  ;;  %s458_s8 = int_to_ptr.vmem [resolvable:$false] %s457_s8 }
  0x3f   : > { %s459_s16 = scalar_lea.vmem %s458_s8, 1024  ;;  %p460_p6 = scmp.lt.s32.totalorder %s685_s17, %s458_s8 }
  0x40   : > { %p455_p3 = pnand %p453_p11, %p409_p1  ;;  %p461_p0 = scmp.lt.s32.totalorder %s459_s16, %s452_s25 }
  0x42   : > { %p456_p8 = pneg %p455_p3  ;;  %p462_p2 = por %p461_p0, %p460_p6 }
  0x44   : > { %p463_p4 = pnand %p462_p2, %p456_p8 }
  0x46   : > { %466 = shalt.err (!%p463_p4)
}
  0x47   : > { %366 = dma.hbm_to_vmem [thread:$0]  (!%p633_p13), %s681_s14, 512, %s685_s17, %s139_s28, %s540_s29, %s540_s29, %s541_s5  }
  0x48   : > { %161 = sbr.rel (%p672_p12) target bundleno = 109 (0x6d), region = 28  ;;  %s719_s30 = sand.u32 (!%p672_p12), 1, %s529_s10  }
  0x49   : > { %s345_s4 = sshll.u32 (!%p672_p12), %s719_s30, 5  ;;  %s164_s19 = scalar_lea.sflag (!%p672_p12), [#allocation3], %s719_s30 }
  0x4a   : > { %s167_s3 = scalar_lea.vmem (!%p672_p12), [#allocation2], %s345_s4  ;;  %p792_p6 = scmp.ne.s32.totalorder (!%p672_p12), %s787_s20, 0 }
  0x4f   : > { %512 = dma.done.wait (%p792_p6), %s164_s19, 512  }
  0x50   : > { %514 = vsyncadd (%p792_p6), %s164_s19, 4294966784  ;;  %s173_s23 = scalar_lea.sflag [#allocation6], %s719_s30  ;;  %s176_s29 = scalar_lea.vmem [#allocation5], %s345_s4 }
  0x51   : > { %516 = dma.done.wait (%p792_p6), %s173_s23, 512  }
  0x52   : > { %518 = vsyncadd (%p792_p6), %s173_s23, 4294966784  ;;  %v204_v0 = vld [vmem:[%s167_s3] sm:$0xff]  ;;  %v205_v1 = vld [vmem:[%s167_s3 + $0x8] sm:$0xff]  ;;  %s347_s5 = sshll.u32 %s719_s30, 3  ;;  %s349_s14 = sshll.u32 %s580_s13, 7 }
  0x53   : > { %v206_v2 = vld [vmem:[%s167_s3 + $0x10] sm:$0xff]  ;;  %v207_v3 = vld [vmem:[%s167_s3 + $0x18] sm:$0xff]  ;;  %v208_v4 = vld [vmem:[%s176_s29] sm:$0xff]  ;;  %v212_v6 = vsub.f32 1.0, %v204_v0  ;;  %v213_v7 = vsub.f32 1.0, %v205_v1  ;;  %s201_s20 = scalar_lea.vmem [#allocation7], %s347_s5  ;;  %s739_s24 = scalar_lea.hbm %s783_s2, %s349_s14 }
  0x54   : > { %v209_v5 = vld [vmem:[%s176_s29 + $0x8] sm:$0xff]  ;;  %v214_v8 = vsub.f32 1.0, %v206_v2  ;;  %v210_v9 = vld [vmem:[%s176_s29 + $0x10] sm:$0xff]  ;;  %v211_v10 = vld [vmem:[%s176_s29 + $0x18] sm:$0xff]  ;;  %v215_v11 = vsub.f32 1.0, %v207_v3  ;;  %s242_s6 = sshll.u32 %s201_s20, 4  ;;  %s734_s6 = int_to_ptr.vmem [resolvable:$true] %s242_s6 }
  0x55   : > { %v216_v12 = vadd.f32 %v212_v6, %v208_v4  ;;  %v217_v13 = vadd.f32 %v213_v7, %v209_v5  ;;  %s229_s26 = scalar_lea.sflag [#allocation4], %s719_s30  ;;  %s467_s27 = scalar_lea.vmem %s734_s6, 128 }
  0x56   : > { %v218_v14 = vadd.f32 %v214_v8, %v210_v9  ;;  %v219_v15 = vadd.f32 %v215_v11, %v211_v10  ;;  %p468_p13 = scmp.ne.s32.totalorder %s734_s6, %s467_s27  ;;  %p793_p1 = scmp.ne.s32.totalorder %s788_s21, 0 }
  0x57   : > { %v220_v16 = vmax.f32 %v216_v12, 0.0  ;;  %v221_v17 = vmax.f32 %v217_v13, 0.0  ;;  %s543_s13 = smov [#allocation7]  }
  0x58   : > { %v222_v18 = vmax.f32 %v218_v14, 0.0  ;;  %v223_v19 = vmax.f32 %v219_v15, 0.0  ;;  %p469_p12 = pnand %p468_p13, %p793_p1  ;;  %s471_s25 = sshll.u32 %s543_s13, 4  ;;  %s472_s25 = int_to_ptr.vmem [resolvable:$false] %s471_s25 }
  0x59   : > { %v224_v20 = vadd.f32 %v221_v17, %v220_v16  ;;  %s473_s7 = scalar_lea.vmem %s472_s25, 256  ;;  %p474_p5 = scmp.lt.s32.totalorder %s734_s6, %s472_s25 }
  0x5a   : > { %p470_p10 = pneg %p469_p12  ;;  %p475_p7 = scmp.lt.s32.totalorder %s473_s7, %s467_s27 }
  0x5b   : > { %v225_v21 = vadd.f32 %v224_v20, %v222_v18 }
  0x5c   : > { %p476_p9 = por %p475_p7, %p474_p5 }
  0x5d   : > { %v226_v22 = vadd.f32 %v225_v21, %v223_v19 }
  0x5e   : > { %p477_p11 = pnand %p476_p9, %p470_p10 }
  0x5f   : > { %227 = vst [vmem:[%s201_s20] sm:$0xff] %v226_v22 }
  0x60   : > { %480 = shalt.err (!%p477_p11)
}
  0x61   : > { %s481_s8 = scalar_lea.hbm %s739_s24, 128  ;;  %s485_s4 = scalar_lea.hbm %s783_s2, 256 }
  0x62   : > { %p482_p3 = scmp.ne.s32.totalorder %s739_s24, %s481_s8  ;;  %p486_p2 = scmp.lt.u32.totalorder %s739_s24, %s783_s2 }
  0x63   : > { %p487_p4 = scmp.lt.u32.totalorder %s485_s4, %s481_s8  ;;  %p489_p13 = scmp.lt.u32.totalorder %s481_s8, %s739_s24 }
  0x64   : > { %p483_p8 = pnand %p482_p3, %p793_p1 }
  0x65   : > { %p488_p6 = por %p487_p4, %p486_p2 }
  0x66   : > { %p484_p0 = pneg %p483_p8 }
  0x67   : > { %p490_p12 = por %p489_p13, %p488_p6 }
  0x69   : > { %p491_p10 = pnand %p490_p12, %p484_p0 }
  0x6b   : > { %494 = shalt.err (!%p491_p10)
}
  0x6c   : > { %358 = dma.vmem_to_hbm [thread:$0]  (%p793_p1), %s734_s6, 128, %s739_s24, %s229_s26  }
  0x6d PF: > { %s254_s23 = sand.u32 1, %s525_s9   ;;  %p794_p5 = scmp.ne.s32.totalorder %s789_s22, 0 }
  0x6e   : > { %p795_p7 = scmp.ge.s32.totalorder %s537_s12, 2  ;;  %s255_s29 = scalar_lea.sflag [#allocation4], %s254_s23 }
  0x70   : > { %p368_p9 = pnand %p795_p7, %p794_p5 }
  0x72   : > { %520 = dma.done.wait (!%p368_p9), %s255_s29, 128  }
  0x73   : > { %522 = vsyncadd (!%p368_p9), %s255_s29, 4294967168  ;;  %p18_p11 = scmp.ge.s32.totalorder %s584_s15, 4   ;;  %s796_s9 = smov %s529_s10 }
  0x74   : > { %s797_s10 = smov %s533_s11  ;;  %s798_s11 = smov %s596_s18 }
  0x75   : > { %s799_s12 = smov %s584_s15  ;;  %20 = sbr.rel (!%p18_p11) target bundleno = 7 (0x7), region = 86 }
  0x7c   :  { %260 = vsyncpa [#allocation3], 1 }
  0x7d   :  { %262 = vsyncpa [#allocation3 + $0x1], 1 }
  0x7e   :  { %263 = vsyncpa [#allocation6], 1 }
  0x7f   :  { %265 = vsyncpa [#allocation6 + $0x1], 1 }
  0x80   :  { %266 = vsyncpa [#allocation4], 1 }
  0x81   :  { %268 = vsyncpa [#allocation4 + $0x1], 1 }

</bundles_post_ra>
